<compile_context>
chip_gen: v6e
topology: v6e:2x2x1
jax: 0.10.0
libtpu: 0.0.40
codegen_flags: <defaults>
</compile_context>

<pallas_src>
import jax
import jax.numpy as jnp
from jax.experimental import pallas as pl
from jax.experimental.pallas import tpu as pltpu


# -----------------------------------------------------------------------------
# Kernel: one batch tile of TILE_N rows, activations laid out (features, TILE_N)
# -----------------------------------------------------------------------------
def mlp_kernel(x_ref,              # (1, 1, TILE_N)  f32
               w1_ref, b1_ref,     # (64, 1)  f32, (64, 1) f32
               w2_ref, b2_ref,     # (128, 64) bf16, (128, 1) f32
               w3_ref, b3_ref,     # (64, 128) bf16, (64, 1) f32
               w4_ref, b4_ref,     # (32, 64)  bf16, (32, 1) f32
               w5_ref, b5_ref,     # (32, 1)  f32, (1, 1) f32
               o_ref):             # (1, 1, TILE_N)  f32
    x = x_ref[0]                                            # (1, TILE_N) f32

    # Linear(1, 64) + ReLU  -- K=1: keep off the MXU, pure VPU broadcast (f32).
    h = jnp.maximum(w1_ref[...] * x + b1_ref[...], 0.0)     # (64, TILE_N) f32

    # Linear(64, 128) + ReLU  (MXU, bf16 inputs, f32 accumulation)
    h = jnp.dot(w2_ref[...], h.astype(jnp.bfloat16),
                preferred_element_type=jnp.float32) + b2_ref[...]
    h = jnp.maximum(h, 0.0)                                  # (128, TILE_N) f32

    # Linear(128, 64) + ReLU  (MXU, bf16)
    h = jnp.dot(w3_ref[...], h.astype(jnp.bfloat16),
                preferred_element_type=jnp.float32) + b3_ref[...]
    h = jnp.maximum(h, 0.0)                                  # (64, TILE_N) f32

    # Linear(64, 32) + ReLU  (MXU, bf16)
    h = jnp.dot(w4_ref[...], h.astype(jnp.bfloat16),
                preferred_element_type=jnp.float32) + b4_ref[...]
    h = jnp.maximum(h, 0.0)                                  # (32, TILE_N) f32

    # Linear(32, 1) -- N_out=1: VPU multiply + sublane reduction instead of MXU.
    out = jnp.sum(h * w5_ref[...], axis=0, keepdims=True) + b5_ref[...]  # (1, TILE_N)
    o_ref[0] = out.astype(o_ref.dtype)


# -----------------------------------------------------------------------------
# Tile-size policy (per perf review):
#   lane multiple of 128; floor 512 (amortize ~0.35us/step overhead);
#   ceiling 8192 (bounds live activations to ~10 MiB); never larger than the
#   128-rounded batch; if the batch supports two >=512-wide tiles, force g>=2
#   so the "parallel" grid axis can shard across v7x's 2 TensorCores.
# -----------------------------------------------------------------------------
def _choose_tile(n, requested_tile):
    n_rows = pl.cdiv(n, 128) * 128
    t = pl.cdiv(int(requested_tile), 128) * 128
    t = min(max(t, 512), 8192)
    t = max(128, min(t, n_rows))
    if n_rows >= 2 * 512 and t > n_rows // 2:
        t = max(512, ((n_rows // 2) // 128) * 128)
    return t


# -----------------------------------------------------------------------------
# Wrapper: pad/reshape the (N, 1) batch into lane-dense (G, 1, TILE_N) slabs,
# pre-transpose the weights (layout plumbing only) and launch a 1-D grid.
# -----------------------------------------------------------------------------
def complex_net_forward(x, params, *, tile_n=4096):
    """x: (N, 1) float32.  params: flat list [w1, b1, ..., w5, b5] (in, out) layout."""
    n = x.shape[0]

    tile_n = _choose_tile(n, tile_n)
    n_pad = pl.cdiv(n, tile_n) * tile_n
    g = n_pad // tile_n

    # Batch on the lane axis: (G, 1, TILE_N).
    x_slab = jnp.pad(x.reshape(-1), (0, n_pad - n)).reshape(g, 1, tile_n)

    # Kernel-side parameter layout: W.T so the kernel computes W.T @ h,
    # biases as (out, 1) columns.  w5 stays (32, 1) for the final reduction.
    # MXU-layer weights (w2/w3/w4) are cast to bf16 once here.
    w1, b1, w2, b2, w3, b3, w4, b4, w5, b5 = params
    kparams = [
        w1.T, b1.T,
        w2.T.astype(jnp.bfloat16), b2.T,
        w3.T.astype(jnp.bfloat16), b3.T,
        w4.T.astype(jnp.bfloat16), b4.T,
        w5, b5,
    ]

    x_spec = pl.BlockSpec((1, 1, tile_n), lambda i: (i, 0, 0))
    out_spec = pl.BlockSpec((1, 1, tile_n), lambda i: (i, 0, 0))
    # Whole-array blocks + constant index_map -> weights DMA'd once, resident.
    w_specs = [pl.BlockSpec(p.shape, lambda i: (0, 0)) for p in kparams]

    flops_per_row = 2 * (1 * 64 + 64 * 128 + 128 * 64 + 64 * 32 + 32 * 1)
    param_bytes = int(sum(p.size * p.dtype.itemsize for p in kparams))
    cost = pl.CostEstimate(
        flops=int(n_pad) * flops_per_row,
        transcendentals=0,
        bytes_accessed=int(n_pad) * 8 + param_bytes,
    )

    out_slab = pl.pallas_call(
        mlp_kernel,
        out_shape=jax.ShapeDtypeStruct((g, 1, tile_n), jnp.float32),
        grid=(g,),
        in_specs=[x_spec] + w_specs,
        out_specs=out_spec,
        compiler_params=pltpu.CompilerParams(
            dimension_semantics=("parallel",),
            # Explicit scoped-VMEM bump so v5e (16 MiB default) handles big tiles.
            vmem_limit_bytes=32 * 1024 * 1024,
        ),
        cost_estimate=cost,
    )(x_slab, *kparams)

    return out_slab.reshape(n_pad)[:n].reshape(n, 1)


# -----------------------------------------------------------------------------
# Deterministic parameter init (PyTorch nn.Linear-style uniform(-k, k),
# k = 1/sqrt(fan_in)), seeded with PRNGKey(0).
# -----------------------------------------------------------------------------
def init_params(key):
    dims = [(1, 64), (64, 128), (128, 64), (64, 32), (32, 1)]
    params = []
    for (fan_in, fan_out) in dims:
        key, kw, kb = jax.random.split(key, 3)
        bound = 1.0 / jnp.sqrt(jnp.float32(fan_in))
        # stored as (in, out) so the reference does x @ W
        w = jax.random.uniform(kw, (fan_in, fan_out), jnp.float32, -bound, bound)
        b = jax.random.uniform(kb, (1, fan_out), jnp.float32, -bound, bound)
        params += [w, b]
    return params


def reference_forward(x, params, *, matmul_dtype=jnp.float32):
    """Pure-JAX reference.  matmul_dtype=bf16 mirrors the kernel's dtype policy
    (layers 2-4 bf16 inputs, f32 accumulation); f32 is the exact reference."""
    hi = jax.lax.Precision.HIGHEST
    h = x
    for i in range(0, 8, 2):
        w, b = params[i], params[i + 1]
        if i in (2, 4, 6):
            z = jnp.dot(h.astype(matmul_dtype), w.astype(matmul_dtype),
                        preferred_element_type=jnp.float32) + b
        else:
            z = jnp.dot(h, w, precision=hi) + b
        h = jnp.maximum(z, 0.0)
    return jnp.dot(h, params[8], precision=hi) + params[9]


if __name__ == "__main__":
    key = jax.random.PRNGKey(0)
    key, kx = jax.random.split(key)

    params = init_params(key)

    # Small batch (single 128-wide tile, one grid step).
    x = jax.random.normal(kx, (8, 1), jnp.float32)   # batch=8, in_features=1
    out = jax.block_until_ready(complex_net_forward(x, params))
    assert out.shape == (8, 1)
    ref_mixed = reference_forward(x, params, matmul_dtype=jnp.bfloat16)
    ref_f32 = reference_forward(x, params)
    assert jnp.allclose(out, ref_mixed, atol=2e-3, rtol=2e-3)
    assert jnp.allclose(out, ref_f32, atol=5e-2, rtol=5e-2)

    # Medium batch: 512-floor tiling + forced g>=2 (megacore path), ragged-free.
    key, kx2 = jax.random.split(key)
    x_mid = jax.random.normal(kx2, (2048, 1), jnp.float32)
    out_mid = jax.block_until_ready(complex_net_forward(x_mid, params))
    assert out_mid.shape == (2048, 1)
    assert jnp.allclose(out_mid, reference_forward(x_mid, params, matmul_dtype=jnp.bfloat16),
                        atol=2e-3, rtol=2e-3)
    assert jnp.allclose(out_mid, reference_forward(x_mid, params), atol=5e-2, rtol=5e-2)

    # Large batch with a ragged tail: default 4096-wide tiles, multi-step grid.
    key, kx3 = jax.random.split(key)
    x_big = jax.random.normal(kx3, (20000, 1), jnp.float32)
    out_big = jax.block_until_ready(complex_net_forward(x_big, params))
    assert out_big.shape == (20000, 1)
    assert jnp.allclose(out_big, reference_forward(x_big, params, matmul_dtype=jnp.bfloat16),
                        atol=2e-3, rtol=2e-3)
    assert jnp.allclose(out_big, reference_forward(x_big, params), atol=5e-2, rtol=5e-2)

    print("KERNEL_OK")
</pallas_src>

<mosaic_0001>
module attributes {stable_mosaic.version = 11 : i64} {
  func.func @mlp_kernel(%arg0: i32, %arg1: memref<1x1x128xf32, #tpu.memory_space<vmem>>, %arg2: memref<64x1xf32, #tpu.memory_space<vmem>>, %arg3: memref<64x1xf32, #tpu.memory_space<vmem>>, %arg4: memref<128x64xbf16, #tpu.memory_space<vmem>>, %arg5: memref<128x1xf32, #tpu.memory_space<vmem>>, %arg6: memref<64x128xbf16, #tpu.memory_space<vmem>>, %arg7: memref<64x1xf32, #tpu.memory_space<vmem>>, %arg8: memref<32x64xbf16, #tpu.memory_space<vmem>>, %arg9: memref<32x1xf32, #tpu.memory_space<vmem>>, %arg10: memref<32x1xf32, #tpu.memory_space<vmem>>, %arg11: memref<1x1xf32, #tpu.memory_space<vmem>>, %arg12: memref<1x1x128xf32, #tpu.memory_space<vmem>>) attributes {dimension_semantics = [#tpu.dimension_semantics<parallel>], iteration_bounds = array<i64: 1>, scalar_prefetch = 0 : i64, scratch_operands = 0 : i64, tpu.core_type = #tpu.core_type<tc>, window_params = [{transform_indices = @transform_0, window_bounds = array<i64: 1, 1, 128>}, {pipeline_mode = #tpu.pipeline_mode<synchronous>, transform_indices = @transform_1, window_bounds = array<i64: 64, 1>}, {pipeline_mode = #tpu.pipeline_mode<synchronous>, transform_indices = @transform_2, window_bounds = array<i64: 64, 1>}, {pipeline_mode = #tpu.pipeline_mode<synchronous>, transform_indices = @transform_3, window_bounds = array<i64: 128, 64>}, {pipeline_mode = #tpu.pipeline_mode<synchronous>, transform_indices = @transform_4, window_bounds = array<i64: 128, 1>}, {pipeline_mode = #tpu.pipeline_mode<synchronous>, transform_indices = @transform_5, window_bounds = array<i64: 64, 128>}, {pipeline_mode = #tpu.pipeline_mode<synchronous>, transform_indices = @transform_6, window_bounds = array<i64: 64, 1>}, {pipeline_mode = #tpu.pipeline_mode<synchronous>, transform_indices = @transform_7, window_bounds = array<i64: 32, 64>}, {pipeline_mode = #tpu.pipeline_mode<synchronous>, transform_indices = @transform_8, window_bounds = array<i64: 32, 1>}, {pipeline_mode = #tpu.pipeline_mode<synchronous>, transform_indices = @transform_9, window_bounds = array<i64: 32, 1>}, {pipeline_mode = #tpu.pipeline_mode<synchronous>, transform_indices = @transform_10, window_bounds = array<i64: 1, 1>}, {transform_indices = @transform_11, window_bounds = array<i64: 1, 1, 128>}]} {
    %c0 = arith.constant 0 : index
    %c0_0 = arith.constant 0 : index
    %c0_1 = arith.constant 0 : index
    %0 = vector.load %arg1[%c0, %c0_0, %c0_1] : memref<1x1x128xf32, #tpu.memory_space<vmem>>, vector<1x1x128xf32>
    %1 = vector.shape_cast %0 : vector<1x1x128xf32> to vector<1x128xf32>
    %c0_2 = arith.constant 0 : index
    %c0_3 = arith.constant 0 : index
    %2 = vector.load %arg2[%c0_2, %c0_3] : memref<64x1xf32, #tpu.memory_space<vmem>>, vector<64x1xf32>
    %3 = vector.broadcast %2 : vector<64x1xf32> to vector<64x128xf32>
    %4 = vector.broadcast %1 : vector<1x128xf32> to vector<64x128xf32>
    %5 = arith.mulf %3, %4 : vector<64x128xf32>
    %c0_4 = arith.constant 0 : index
    %c0_5 = arith.constant 0 : index
    %6 = vector.load %arg3[%c0_4, %c0_5] : memref<64x1xf32, #tpu.memory_space<vmem>>, vector<64x1xf32>
    %7 = vector.broadcast %6 : vector<64x1xf32> to vector<64x128xf32>
    %8 = arith.addf %5, %7 : vector<64x128xf32>
    %cst = arith.constant 0.000000e+00 : f32
    %9 = vector.broadcast %cst : f32 to vector<64x128xf32>
    %10 = arith.maximumf %8, %9 : vector<64x128xf32>
    %c0_6 = arith.constant 0 : index
    %c0_7 = arith.constant 0 : index
    %11 = vector.load %arg4[%c0_6, %c0_7] : memref<128x64xbf16, #tpu.memory_space<vmem>>, vector<128x64xbf16>
    %12 = arith.truncf %10 : vector<64x128xf32> to vector<64x128xbf16>
    %cst_8 = arith.constant dense<0.000000e+00> : vector<128x128xf32>
    %13 = tpu.matmul %11, %12, %cst_8 {dimension_numbers = #tpu.dot_dimension_numbers<[1], [0], [0], [1], [0, 0, 1, 1], [], []>} : vector<128x64xbf16>, vector<64x128xbf16>, vector<128x128xf32> -> vector<128x128xf32>
    %c0_9 = arith.constant 0 : index
    %c0_10 = arith.constant 0 : index
    %14 = vector.load %arg5[%c0_9, %c0_10] : memref<128x1xf32, #tpu.memory_space<vmem>>, vector<128x1xf32>
    %15 = vector.broadcast %14 : vector<128x1xf32> to vector<128x128xf32>
    %16 = arith.addf %13, %15 : vector<128x128xf32>
    %cst_11 = arith.constant 0.000000e+00 : f32
    %17 = vector.broadcast %cst_11 : f32 to vector<128x128xf32>
    %18 = arith.maximumf %16, %17 : vector<128x128xf32>
    %c0_12 = arith.constant 0 : index
    %c0_13 = arith.constant 0 : index
    %19 = vector.load %arg6[%c0_12, %c0_13] : memref<64x128xbf16, #tpu.memory_space<vmem>>, vector<64x128xbf16>
    %20 = arith.truncf %18 : vector<128x128xf32> to vector<128x128xbf16>
    %cst_14 = arith.constant dense<0.000000e+00> : vector<64x128xf32>
    %21 = tpu.matmul %19, %20, %cst_14 {dimension_numbers = #tpu.dot_dimension_numbers<[1], [0], [0], [1], [0, 0, 1, 1], [], []>} : vector<64x128xbf16>, vector<128x128xbf16>, vector<64x128xf32> -> vector<64x128xf32>
    %c0_15 = arith.constant 0 : index
    %c0_16 = arith.constant 0 : index
    %22 = vector.load %arg7[%c0_15, %c0_16] : memref<64x1xf32, #tpu.memory_space<vmem>>, vector<64x1xf32>
    %23 = vector.broadcast %22 : vector<64x1xf32> to vector<64x128xf32>
    %24 = arith.addf %21, %23 : vector<64x128xf32>
    %cst_17 = arith.constant 0.000000e+00 : f32
    %25 = vector.broadcast %cst_17 : f32 to vector<64x128xf32>
    %26 = arith.maximumf %24, %25 : vector<64x128xf32>
    %c0_18 = arith.constant 0 : index
    %c0_19 = arith.constant 0 : index
    %27 = vector.load %arg8[%c0_18, %c0_19] : memref<32x64xbf16, #tpu.memory_space<vmem>>, vector<32x64xbf16>
    %28 = arith.truncf %26 : vector<64x128xf32> to vector<64x128xbf16>
    %cst_20 = arith.constant dense<0.000000e+00> : vector<32x128xf32>
    %29 = tpu.matmul %27, %28, %cst_20 {dimension_numbers = #tpu.dot_dimension_numbers<[1], [0], [0], [1], [0, 0, 1, 1], [], []>} : vector<32x64xbf16>, vector<64x128xbf16>, vector<32x128xf32> -> vector<32x128xf32>
    %c0_21 = arith.constant 0 : index
    %c0_22 = arith.constant 0 : index
    %30 = vector.load %arg9[%c0_21, %c0_22] : memref<32x1xf32, #tpu.memory_space<vmem>>, vector<32x1xf32>
    %31 = vector.broadcast %30 : vector<32x1xf32> to vector<32x128xf32>
    %32 = arith.addf %29, %31 : vector<32x128xf32>
    %cst_23 = arith.constant 0.000000e+00 : f32
    %33 = vector.broadcast %cst_23 : f32 to vector<32x128xf32>
    %34 = arith.maximumf %32, %33 : vector<32x128xf32>
    %c0_24 = arith.constant 0 : index
    %c0_25 = arith.constant 0 : index
    %35 = vector.load %arg10[%c0_24, %c0_25] : memref<32x1xf32, #tpu.memory_space<vmem>>, vector<32x1xf32>
    %36 = vector.broadcast %35 : vector<32x1xf32> to vector<32x128xf32>
    %37 = arith.mulf %34, %36 : vector<32x128xf32>
    %cst_26 = arith.constant dense<0.000000e+00> : vector<128xf32>
    %38 = vector.multi_reduction <add>, %37, %cst_26 [0] : vector<32x128xf32> to vector<128xf32>
    %39 = vector.shape_cast %38 : vector<128xf32> to vector<1x128xf32>
    %c0_27 = arith.constant 0 : index
    %c0_28 = arith.constant 0 : index
    %40 = vector.load %arg11[%c0_27, %c0_28] : memref<1x1xf32, #tpu.memory_space<vmem>>, vector<1x1xf32>
    %41 = vector.broadcast %40 : vector<1x1xf32> to vector<1x128xf32>
    %42 = arith.addf %39, %41 : vector<1x128xf32>
    %c0_29 = arith.constant 0 : index
    %c0_30 = arith.constant 0 : index
    %c0_31 = arith.constant 0 : index
    %43 = vector.load %arg12[%c0_29, %c0_30, %c0_31] : memref<1x1x128xf32, #tpu.memory_space<vmem>>, vector<1x1x128xf32>
    %44 = vector.shape_cast %43 : vector<1x1x128xf32> to vector<1x128xf32>
    %45 = vector.shape_cast %42 : vector<1x128xf32> to vector<1x1x128xf32>
    tpu.vector_store %arg12[%c0_29, %c0_30, %c0_31], %45 {strides = array<i32>} : memref<1x1x128xf32, #tpu.memory_space<vmem>>, vector<1x1x128xf32>,
    return
  }
  func.func @transform_0(%arg0: i32) -> (i32, i32, i32) {
    %c0_i32 = arith.constant 0 : i32
    %c0_i32_0 = arith.constant 0 : i32
    %c0_i32_1 = arith.constant 0 : i32
    return %arg0, %c0_i32, %c0_i32_0 : i32, i32, i32
  }
  func.func @transform_1(%arg0: i32) -> (i32, i32) {
    %c0_i32 = arith.constant 0 : i32
    %c0_i32_0 = arith.constant 0 : i32
    %c0_i32_1 = arith.constant 0 : i32
    return %c0_i32, %c0_i32_0 : i32, i32
  }
  func.func @transform_2(%arg0: i32) -> (i32, i32) {
    %c0_i32 = arith.constant 0 : i32
    %c0_i32_0 = arith.constant 0 : i32
    %c0_i32_1 = arith.constant 0 : i32
    return %c0_i32, %c0_i32_0 : i32, i32
  }
  func.func @transform_3(%arg0: i32) -> (i32, i32) {
    %c0_i32 = arith.constant 0 : i32
    %c0_i32_0 = arith.constant 0 : i32
    %c0_i32_1 = arith.constant 0 : i32
    return %c0_i32, %c0_i32_0 : i32, i32
  }
  func.func @transform_4(%arg0: i32) -> (i32, i32) {
    %c0_i32 = arith.constant 0 : i32
    %c0_i32_0 = arith.constant 0 : i32
    %c0_i32_1 = arith.constant 0 : i32
    return %c0_i32, %c0_i32_0 : i32, i32
  }
  func.func @transform_5(%arg0: i32) -> (i32, i32) {
    %c0_i32 = arith.constant 0 : i32
    %c0_i32_0 = arith.constant 0 : i32
    %c0_i32_1 = arith.constant 0 : i32
    return %c0_i32, %c0_i32_0 : i32, i32
  }
  func.func @transform_6(%arg0: i32) -> (i32, i32) {
    %c0_i32 = arith.constant 0 : i32
    %c0_i32_0 = arith.constant 0 : i32
    %c0_i32_1 = arith.constant 0 : i32
    return %c0_i32, %c0_i32_0 : i32, i32
  }
  func.func @transform_7(%arg0: i32) -> (i32, i32) {
    %c0_i32 = arith.constant 0 : i32
    %c0_i32_0 = arith.constant 0 : i32
    %c0_i32_1 = arith.constant 0 : i32
    return %c0_i32, %c0_i32_0 : i32, i32
  }
  func.func @transform_8(%arg0: i32) -> (i32, i32) {
    %c0_i32 = arith.constant 0 : i32
    %c0_i32_0 = arith.constant 0 : i32
    %c0_i32_1 = arith.constant 0 : i32
    return %c0_i32, %c0_i32_0 : i32, i32
  }
  func.func @transform_9(%arg0: i32) -> (i32, i32) {
    %c0_i32 = arith.constant 0 : i32
    %c0_i32_0 = arith.constant 0 : i32
    %c0_i32_1 = arith.constant 0 : i32
    return %c0_i32, %c0_i32_0 : i32, i32
  }
  func.func @transform_10(%arg0: i32) -> (i32, i32) {
    %c0_i32 = arith.constant 0 : i32
    %c0_i32_0 = arith.constant 0 : i32
    %c0_i32_1 = arith.constant 0 : i32
    return %c0_i32, %c0_i32_0 : i32, i32
  }
  func.func @transform_11(%arg0: i32) -> (i32, i32, i32) {
    %c0_i32 = arith.constant 0 : i32
    %c0_i32_0 = arith.constant 0 : i32
    %c0_i32_1 = arith.constant 0 : i32
    return %arg0, %c0_i32, %c0_i32_0 : i32, i32, i32
  }
}

</mosaic_0001>

<bundles_post_ra>
// kernel: tpu_custom_call.1
= control target key start
LH: loop header
LB: loop body
LE: loop exit
PB: predicated region body
PF: predicated region fallthrough
CT: control target
= control target key end

     0   :  { %s1219_s0 = inlined_call_operand.vmem [shape: f32[1,1,128], index: 0, kind: input, shape index: {}]   ;;  %s1220_s1 = inlined_call_operand.vmem [shape: f32[64,1], index: 1, kind: input, shape index: {}]   ;;  %s1221_s2 = inlined_call_operand.vmem [shape: f32[64,1], index: 2, kind: input, shape index: {}]   ;;  %s1222_s3 = inlined_call_operand.vmem [shape: bf16[128,64], index: 3, kind: input, shape index: {}]   ;;  %s1223_s4 = inlined_call_operand.vmem [shape: f32[128,1], index: 4, kind: input, shape index: {}]   ;;  %s1224_s5 = inlined_call_operand.vmem [shape: bf16[64,128], index: 5, kind: input, shape index: {}]   ;;  %s1225_s6 = inlined_call_operand.vmem [shape: f32[64,1], index: 6, kind: input, shape index: {}]   ;;  %s1226_s7 = inlined_call_operand.vmem [shape: bf16[32,64], index: 7, kind: input, shape index: {}]   ;;  %s1227_s8 = inlined_call_operand.vmem [shape: f32[32,1], index: 8, kind: input, shape index: {}]   ;;  %s1228_s9 = inlined_call_operand.vmem [shape: f32[32,1], index: 9, kind: input, shape index: {}]   ;;  %s1229_s10 = inlined_call_operand.<no memory space> [shape: f32[1,1], index: 10, kind: input, shape index: {}]   ;;  %s1230_s11 = inlined_call_operand.hbm [shape: f32[1,1,128], index: 11, kind: output, shape index: {}]  }
   0x1   :  { %v16_v0 = vstv %s1229_s10 }
   0x2   :  { %17 = vst [vmem:[#allocation2] sm:$0x1] %v16_v0 }
   0x3   :  { %v111_v1 = vld [vmem:[%s1221_s2 + $0x30] sm:$0xff]  ;;  %v943_v3 = vmov 0   ;;  %v112_v4 = vld [vmem:[%s1221_s2 + $0x38] sm:$0xff]  ;;  %v48_v6 = vld [vmem:[%s1220_s1 + $0x28] sm:$0xff] }
   0x4   :  { %v49_v2 = vld [vmem:[%s1220_s1 + $0x30] sm:$0xff]  ;;  %906 = vset.pattern.permute.xlu1 %v943_v3  ;;  %905 = vset.pattern.permute.xlu0 %v943_v3  ;;  %v50_v5 = vld [vmem:[%s1220_s1 + $0x38] sm:$0xff]  ;;  %v47_v7 = vld [vmem:[%s1220_s1 + $0x20] sm:$0xff] }
   0x5   :  { %145 = vperm.xlu1 %906, %v111_v1   ;;  %83 = vperm.xlu0 %905, %v49_v2   ;;  %v110_v8 = vld [vmem:[%s1221_s2 + $0x28] sm:$0xff]  ;;  %v109_v9 = vld [vmem:[%s1221_s2 + $0x20] sm:$0xff]  ;;  %v46_v10 = vld [vmem:[%s1220_s1 + $0x18] sm:$0xff] }
   0x6   :  { %v45_v11 = vld [vmem:[%s1220_s1 + $0x10] sm:$0xff]  ;;  %v108_v12 = vld [vmem:[%s1221_s2 + $0x18] sm:$0xff]  ;;  %v44_v14 = vld [vmem:[%s1220_s1 + $0x8] sm:$0xff] }
   0x7   :  { %v107_v13 = vld [vmem:[%s1221_s2 + $0x10] sm:$0xff]  ;;  %v43_v15 = vld [vmem:[%s1220_s1] sm:$0xff] }
   0x9   :  { %150 = vperm.xlu1 %906, %v112_v4   ;;  %88 = vperm.xlu0 %905, %v50_v5  }
   0xd   :  { %78 = vperm.xlu1 %906, %v48_v6   ;;  %73 = vperm.xlu0 %905, %v47_v7  }
  0x11   :  { %140 = vperm.xlu1 %906, %v110_v8   ;;  %135 = vperm.xlu0 %905, %v109_v9  }
  0x15   :  { %68 = vperm.xlu1 %906, %v46_v10   ;;  %63 = vperm.xlu0 %905, %v45_v11  }
  0x19   :  { %130 = vperm.xlu1 %906, %v108_v12   ;;  %125 = vperm.xlu0 %905, %v107_v13  }
  0x1d   :  { %58 = vperm.xlu1 %906, %v44_v14   ;;  %53 = vperm.xlu0 %905, %v43_v15  }
  0x1e   :  { %18 = vsyncpa [#allocation4], 0  ;;  %v106_v16 = vld [vmem:[%s1221_s2 + $0x8] sm:$0xff]  ;;  %v105_v17 = vld [vmem:[%s1221_s2] sm:$0xff]  ;;  %vm325_vm0 = vcmask 523264  }
  0x1f   :  { %v204_v18 = vld [vmem:[%s1223_s4 + $0x78] sm:$0xff]  ;;  %v203_v19 = vld [vmem:[%s1223_s4 + $0x70] sm:$0xff]  ;;  %v907_v20 = vld [vmem:[%s1222_s3] sm:$0xff]  }
  0x20   :  { %v202_v21 = vld [vmem:[%s1223_s4 + $0x68] sm:$0xff]  ;;  %v201_v22 = vld [vmem:[%s1223_s4 + $0x60] sm:$0xff]  ;;  %851 = vmatprep.mubr.msk.bf16.mxu0 %vm325_vm0, %v907_v20  ;;  %v200_v23 = vld [vmem:[%s1223_s4 + $0x58] sm:$0xff] }
  0x21   :  { %120 = vperm.xlu1 %906, %v106_v16   ;;  %115 = vperm.xlu0 %905, %v105_v17   ;;  %v199_v24 = vld [vmem:[%s1223_s4 + $0x50] sm:$0xff]  ;;  %v198_v25 = vld [vmem:[%s1223_s4 + $0x48] sm:$0xff]  ;;  %v197_v26 = vld [vmem:[%s1223_s4 + $0x40] sm:$0xff] }
  0x22   :  { %v196_v27 = vld [vmem:[%s1223_s4 + $0x38] sm:$0xff]  ;;  %v195_v28 = vld [vmem:[%s1223_s4 + $0x30] sm:$0xff]  ;;  %v194_v29 = vld [vmem:[%s1223_s4 + $0x28] sm:$0xff] }
  0x23   :  { %v193_v30 = vld [vmem:[%s1223_s4 + $0x20] sm:$0xff]  ;;  %v192_v31 = vld [vmem:[%s1223_s4 + $0x18] sm:$0xff]  ;;  %v191_v32 = vld [vmem:[%s1223_s4 + $0x10] sm:$0xff] }
  0x24   :  { %v190_v33 = vld [vmem:[%s1223_s4 + $0x8] sm:$0xff]  ;;  %v189_v34 = vld [vmem:[%s1223_s4] sm:$0xff]  ;;  %v486_v35 = vld [vmem:[%s1225_s6 + $0x38] sm:$0xff] }
  0x25   :  { %282 = vperm.xlu1 %906, %v204_v18   ;;  %277 = vperm.xlu0 %905, %v203_v19   ;;  %v485_v36 = vld [vmem:[%s1225_s6 + $0x30] sm:$0xff]  ;;  %v484_v37 = vld [vmem:[%s1225_s6 + $0x28] sm:$0xff]  ;;  %v483_v38 = vld [vmem:[%s1225_s6 + $0x20] sm:$0xff] }
  0x26   :  { %v482_v39 = vld [vmem:[%s1225_s6 + $0x18] sm:$0xff]  ;;  %v481_v40 = vld [vmem:[%s1225_s6 + $0x10] sm:$0xff]  ;;  %v480_v41 = vld [vmem:[%s1225_s6 + $0x8] sm:$0xff] }
  0x27   :  { %v479_v42 = vld [vmem:[%s1225_s6] sm:$0xff]  ;;  %v633_v43 = vld [vmem:[%s1227_s8 + $0x8] sm:$0xff]  ;;  %v635_v45 = vld [vmem:[%s1227_s8 + $0x18] sm:$0xff] }
  0x28   :  { %v632_v44 = vld [vmem:[%s1227_s8] sm:$0xff]  ;;  %v634_v46 = vld [vmem:[%s1227_s8 + $0x10] sm:$0xff]  ;;  %v726_v47 = vld [vmem:[%s1228_s9 + $0x8] sm:$0xff] }
  0x29   :  { %272 = vperm.xlu1 %906, %v202_v21   ;;  %267 = vperm.xlu0 %905, %v201_v22   ;;  %v725_v48 = vld [vmem:[%s1228_s9] sm:$0xff]  ;;  %v728_v49 = vld [vmem:[%s1228_s9 + $0x18] sm:$0xff]  ;;  %v727_v50 = vld [vmem:[%s1228_s9 + $0x10] sm:$0xff] }
  0x2a   :  { %v762_v51 = vld [vmem:[#allocation2] sm:$0x1] }
  0x2b   :  { %v788_v52 = vld [vmem:[%s1219_s0] ss:$0 sm:$0xff] }
  0x2d   :  { %262 = vperm.xlu1 %906, %v200_v23   ;;  %257 = vperm.xlu0 %905, %v199_v24  }
  0x31   :  { %252 = vperm.xlu1 %906, %v198_v25   ;;  %247 = vperm.xlu0 %905, %v197_v26  }
  0x35   :  { %242 = vperm.xlu1 %906, %v196_v27   ;;  %237 = vperm.xlu0 %905, %v195_v28  }
  0x39   :  { %232 = vperm.xlu1 %906, %v194_v29   ;;  %227 = vperm.xlu0 %905, %v193_v30  }
  0x3d   :  { %222 = vperm.xlu1 %906, %v192_v31   ;;  %217 = vperm.xlu0 %905, %v191_v32  }
  0x41   :  { %212 = vperm.xlu1 %906, %v190_v33   ;;  %207 = vperm.xlu0 %905, %v189_v34   ;;  %v908_v33 = vld [vmem:[%s1222_s3 + $0x8] sm:$0xff]   ;;  %v909_v34 = vld [vmem:[%s1222_s3 + $0x10] sm:$0xff]  }
  0x45   :  { %524 = vperm.xlu1 %906, %v486_v35   ;;  %519 = vperm.xlu0 %905, %v485_v36   ;;  %v910_v35 = vld [vmem:[%s1222_s3 + $0x18] sm:$0xff]   ;;  %v911_v36 = vld [vmem:[%s1222_s3 + $0x20] sm:$0xff]  }
  0x49   :  { %514 = vperm.xlu1 %906, %v484_v37   ;;  %509 = vperm.xlu0 %905, %v483_v38   ;;  %v912_v37 = vld [vmem:[%s1222_s3 + $0x28] sm:$0xff]   ;;  %v913_v38 = vld [vmem:[%s1222_s3 + $0x30] sm:$0xff]  }
  0x4d   :  { %504 = vperm.xlu1 %906, %v482_v39   ;;  %499 = vperm.xlu0 %905, %v481_v40   ;;  %v914_v39 = vld [vmem:[%s1222_s3 + $0x38] sm:$0xff]   ;;  %v915_v40 = vld [vmem:[%s1224_s5] sm:$0xff]  }
  0x4e   :  { %883 = vmatprep.mubr.bf16.mxu1 %v915_v40 }
  0x51   :  { %494 = vperm.xlu1 %906, %v480_v41   ;;  %489 = vperm.xlu0 %905, %v479_v42  }
  0x55   :  { %643 = vperm.xlu1 %906, %v633_v43   ;;  %638 = vperm.xlu0 %905, %v632_v44  }
  0x59   :  { %653 = vperm.xlu1 %906, %v635_v45   ;;  %648 = vperm.xlu0 %905, %v634_v46  }
  0x5d   :  { %736 = vperm.xlu1 %906, %v726_v47   ;;  %731 = vperm.xlu0 %905, %v725_v48  }
  0x61   :  { %746 = vperm.xlu1 %906, %v728_v49   ;;  %741 = vperm.xlu0 %905, %v727_v50  }
  0x65   :  { %765 = vperm.xlu0 %905, %v762_v51  }
  0x80   :  { %v146_v53 = vpop.permute.xlu1 %145  ;;  %v84_v54 = vpop.permute.xlu0 %83 }
  0x81   :  { %v103_v55 = vmul.f32 %v788_v52, %v84_v54 }
  0x83   :  { %v159_v58 = vadd.f32 %v146_v53, %v103_v55 }
  0x84   :  { %v151_v56 = vpop.permute.xlu1 %150  ;;  %v89_v57 = vpop.permute.xlu0 %88 }
  0x85   :  { %v104_v59 = vmul.f32 %v788_v52, %v89_v57  ;;  %v167_v63 = vmax.f32 %v159_v58, 0.0 }
  0x87   :  { %v160_v60 = vadd.f32 %v151_v56, %v104_v59 }
  0x88   :  { %v79_v61 = vpop.permute.xlu1 %78  ;;  %v74_v62 = vpop.permute.xlu0 %73 }
  0x89   :  { %v168_v0 = vmax.f32 %v160_v60, 0.0  ;;  %v102_v1 = vmul.f32 %v788_v52, %v79_v61  ;;  %v101_v2 = vmul.f32 %v788_v52, %v74_v62 }
  0x8b   :  { %v188_v3 = vpack.c.bf16 %v168_v0, %v167_v63 }
  0x8c   :  { %v141_v4 = vpop.permute.xlu1 %140  ;;  %v136_v5 = vpop.permute.xlu0 %135 }
  0x8d   :  { %v158_v6 = vadd.f32 %v141_v4, %v102_v1  ;;  %v157_v7 = vadd.f32 %v136_v5, %v101_v2  ;;  %843 = vmatprep.subr.bf16.mxu0 %v188_v3 }
  0x8e   :  { %844 = vmatpush3.bf16.msra.mxu0 %v188_v3 }
  0x8f   :  { %v166_v8 = vmax.f32 %v158_v6, 0.0  ;;  %v165_v9 = vmax.f32 %v157_v7, 0.0 }
  0x90   :  { %v69_v10 = vpop.permute.xlu1 %68  ;;  %v64_v11 = vpop.permute.xlu0 %63 }
  0x91   :  { %v187_v12 = vpack.c.bf16 %v166_v8, %v165_v9  ;;  %v100_v13 = vmul.f32 %v788_v52, %v69_v10  ;;  %v99_v14 = vmul.f32 %v788_v52, %v64_v11 }
  0x93   :  { %845 = vmatprep.subr.bf16.mxu0 %v187_v12 }
  0x94   :  { %v131_v15 = vpop.permute.xlu1 %130  ;;  %v126_v16 = vpop.permute.xlu0 %125  ;;  %846 = vmatpush3.bf16.msra.mxu0 %v187_v12 }
  0x95   :  { %v156_v17 = vadd.f32 %v131_v15, %v100_v13  ;;  %v155_v18 = vadd.f32 %v126_v16, %v99_v14 }
  0x97   :  { %v164_v19 = vmax.f32 %v156_v17, 0.0  ;;  %v163_v20 = vmax.f32 %v155_v18, 0.0 }
  0x98   :  { %v59_v21 = vpop.permute.xlu1 %58  ;;  %v54_v22 = vpop.permute.xlu0 %53 }
  0x99   :  { %v186_v23 = vpack.c.bf16 %v164_v19, %v163_v20  ;;  %v98_v24 = vmul.f32 %v788_v52, %v59_v21  ;;  %v97_v25 = vmul.f32 %v788_v52, %v54_v22 }
  0x9b   :  { %847 = vmatprep.subr.bf16.mxu0 %v186_v23 }
  0x9c   :  { %v121_v26 = vpop.permute.xlu1 %120  ;;  %v116_v27 = vpop.permute.xlu0 %115  ;;  %848 = vmatpush3.bf16.msra.mxu0 %v186_v23 }
  0x9d   :  { %v154_v28 = vadd.f32 %v121_v26, %v98_v24  ;;  %v153_v29 = vadd.f32 %v116_v27, %v97_v25 }
  0x9f   :  { %v162_v30 = vmax.f32 %v154_v28, 0.0  ;;  %v161_v31 = vmax.f32 %v153_v29, 0.0 }
  0xa0   :  { %v283_v45 = vpop.permute.xlu1 %282  ;;  %v278_v47 = vpop.permute.xlu0 %277 }
  0xa1   :  { %v185_v32 = vpack.c.bf16 %v162_v30, %v161_v31 }
  0xa3   :  { %849 = vmatprep.subr.bf16.mxu0 %v185_v32 }
  0xa4   :  { %850 = vmatpush3.bf16.msra.mxu0 %v185_v32  ;;  %v273_v50 = vpop.permute.xlu1 %272  ;;  %v268_v52 = vpop.permute.xlu0 %267 }
  0xa7   :  { %852 = vmatmul.mubr.msk.bf16.vlgmr.msra.gmra.mxu0 %vm325_vm0, %v908_v33 }
  0xa8   :  { %855 = vmatprep.mubr.msk.bf16.mxu0 %vm325_vm0, %v909_v34  ;;  %v263_v55 = vpop.permute.xlu1 %262  ;;  %v258_v57 = vpop.permute.xlu0 %257 }
  0xac   :  { %v253_v60 = vpop.permute.xlu1 %252  ;;  %v248_v63 = vpop.permute.xlu0 %247 }
  0xaf   :  { %856 = vmatmul.mubr.msk.bf16.gmra.mxu0 %vm325_vm0, %v910_v35 }
  0xb0   :  { %859 = vmatprep.mubr.msk.bf16.mxu0 %vm325_vm0, %v911_v36  ;;  %v243_v8 = vpop.permute.xlu1 %242  ;;  %v238_v13 = vpop.permute.xlu0 %237 }
  0xb4   :  { %v233_v19 = vpop.permute.xlu1 %232  ;;  %v228_v23 = vpop.permute.xlu0 %227 }
  0xb7   :  { %860 = vmatmul.mubr.msk.bf16.gmra.mxu0 %vm325_vm0, %v912_v37 }
  0xb8   :  { %863 = vmatprep.mubr.msk.bf16.mxu0 %vm325_vm0, %v913_v38  ;;  %v223_v29 = vpop.permute.xlu1 %222  ;;  %v218_v32 = vpop.permute.xlu0 %217 }
  0xbc   :  { %v213_v38 = vpop.permute.xlu1 %212 }
  0xbf   :  { %864 = vmatmul.mubr.msk.bf16.gmra.mxu0 %vm325_vm0, %v914_v39 }
 0x167   :  { %v1190_v41 = vpop.f32.mrf.mxu0 }
 0x168   :  { %v393_v36 = vadd.f32 %v1190_v41, %v218_v32  ;;  %v916_v41 = vld [vmem:[%s1224_s5 + $0x8] sm:$0xff]  }
 0x169   :  { %v1192_v42 = vpop.f32.mrf.mxu0 }
 0x16b   :  { %v854_v43 = vpop.f32.mrf.mxu0 }
 0x16c   :  { %v396_v33 = vadd.f32 %v854_v43, %v223_v29 }
 0x16d   :  { %v1194_v44 = vpop.f32.mrf.mxu0 }
 0x16e   :  { %v450_v39 = vmax.f32 %v396_v33, 0.0  ;;  %v388_v40 = vadd.f32 %v1194_v44, %v213_v38  ;;  %v917_v44 = vld [vmem:[%s1224_s5 + $0x10] sm:$0xff]  }
 0x16f   :  { %v857_v46 = vpop.f32.mrf.mxu0 }
 0x170   :  { %v409_v24 = vadd.f32 %v857_v46, %v238_v13  ;;  %v208_v46 = vpop.permute.xlu0 %207  ;;  %v448_v43 = vmax.f32 %v388_v40, 0.0 }
 0x171   :  { %v400_v48 = vpop.f32.mrf.mxu0 }
 0x172   :  { %v453_v30 = vmax.f32 %v409_v24, 0.0  ;;  %v401_v31 = vadd.f32 %v400_v48, %v228_v23  ;;  %v385_v48 = vadd.f32 %v1192_v42, %v208_v46  ;;  %v918_v42 = vld [vmem:[%s1224_s5 + $0x18] sm:$0xff]  }
 0x173   :  { %v858_v49 = vpop.f32.mrf.mxu0 }
 0x174   :  { %v412_v20 = vadd.f32 %v858_v49, %v243_v8  ;;  %v451_v37 = vmax.f32 %v401_v31, 0.0 }
 0x175   :  { %v403_v51 = vpop.f32.mrf.mxu0 }
 0x176   :  { %v454_v26 = vmax.f32 %v412_v20, 0.0  ;;  %v404_v27 = vadd.f32 %v403_v51, %v233_v19 }
 0x177   :  { %v861_v53 = vpop.f32.mrf.mxu0 }
 0x178   :  { %v425_v9 = vadd.f32 %v861_v53, %v258_v57  ;;  %v474_v34 = vpack.c.bf16 %v454_v26, %v453_v30  ;;  %v452_v35 = vmax.f32 %v404_v27, 0.0  ;;  %v525_v53 = vpop.permute.xlu1 %524 }
 0x179   :  { %v416_v54 = vpop.f32.mrf.mxu0 }
 0x17a   :  { %v457_v17 = vmax.f32 %v425_v9, 0.0  ;;  %v417_v18 = vadd.f32 %v416_v54, %v248_v63 }
 0x17b   :  { %v862_v56 = vpop.f32.mrf.mxu0 }
 0x17c   :  { %v428_v4 = vadd.f32 %v862_v56, %v263_v55  ;;  %v455_v25 = vmax.f32 %v417_v18, 0.0  ;;  %v520_v55 = vpop.permute.xlu0 %519 }
 0x17d   :  { %v419_v58 = vpop.f32.mrf.mxu0 }
 0x17e   :  { %v458_v14 = vmax.f32 %v428_v4, 0.0  ;;  %v420_v15 = vadd.f32 %v419_v58, %v253_v60  ;;  %v515_v58 = vpop.permute.xlu1 %514 }
 0x17f   :  { %v865_v59 = vpop.f32.mrf.mxu0 }
 0x180   :  { %v441_v62 = vadd.f32 %v865_v59, %v278_v47  ;;  %v476_v21 = vpack.c.bf16 %v458_v14, %v457_v17  ;;  %v456_v22 = vmax.f32 %v420_v15, 0.0  ;;  %v449_v47 = vmax.f32 %v393_v36, 0.0  ;;  %v510_v60 = vpop.permute.xlu0 %509 }
 0x181   :  { %v432_v61 = vpop.f32.mrf.mxu0 }
 0x182   :  { %v433_v1 = vadd.f32 %v432_v61, %v268_v52  ;;  %v461_v5 = vmax.f32 %v441_v62, 0.0  ;;  %v475_v28 = vpack.c.bf16 %v456_v22, %v455_v25  ;;  %v472_v49 = vpack.c.bf16 %v450_v39, %v449_v47  ;;  %v919_v52 = vld [vmem:[%s1226_s7] sm:$0xff]   ;;  %v920_v25 = vld [vmem:[%s1226_s7 + $0x8] sm:$0xff]   ;;  %s944_s7 = smov [#allocation3]  }
 0x183   :  { %v866_v0 = vpop.f32.mrf.mxu0  ;;  %899 = vmatprep.mubr.msk.bf16.mxu0 %vm325_vm0, %v919_v52  ;;  %v768_v52 = vlaneseq  ;;  %s780_s27 = sshll.u32 %s944_s7, 4  ;;  %s781_s27 = int_to_ptr.vmem [resolvable:$true] %s780_s27 }
 0x184   :  { %v444_v2 = vadd.f32 %v866_v0, %v283_v45  ;;  %v459_v10 = vmax.f32 %v433_v1, 0.0  ;;  %v473_v45 = vpack.c.bf16 %v452_v35, %v451_v37  ;;  %v505_v0 = vpop.permute.xlu1 %504  ;;  %v500_v4 = vpop.permute.xlu0 %499  ;;  %s921_s8 = scalar_lea.vmem %s781_s27, 16  ;;  %s925_s4 = scalar_lea.vmem %s781_s27, 32 }
 0x185   :  { %v435_v3 = vpop.f32.mrf.mxu0  ;;  %p922_p0 = scmp.ne.s32.totalorder %s781_s27, %s921_s8  ;;  %p926_p1 = scmp.lt.s32.totalorder %s781_s27, %s781_s27 }
 0x186   :  { %v462_v6 = vmax.f32 %v444_v2, 0.0  ;;  %v436_v7 = vadd.f32 %v435_v3, %v273_v50  ;;  %v447_v50 = vmax.f32 %v385_v48, 0.0  ;;  %p927_p2 = scmp.lt.s32.totalorder %s925_s4, %s921_s8 }
 0x188   :  { %v460_v11 = vmax.f32 %v436_v7, 0.0  ;;  %v478_v12 = vpack.c.bf16 %v462_v6, %v461_v5  ;;  %v471_v51 = vpack.c.bf16 %v448_v43, %v447_v50  ;;  %v495_v14 = vpop.permute.xlu1 %494  ;;  %v490_v18 = vpop.permute.xlu0 %489  ;;  %p928_p3 = por %p927_p2, %p926_p1 }
 0x18a   :  { %v477_v16 = vpack.c.bf16 %v460_v11, %v459_v10  ;;  %867 = vmatprep.subr.bf16.mxu1 %v478_v12  ;;  %p929_p4 = pnand %p928_p3, %p922_p0 }
 0x18b   :  { %868 = vmatpush3.bf16.msra.mxu1 %v478_v12 }
 0x18c   :  { %869 = vmatprep.subr.bf16.mxu1 %v477_v16  ;;  %v639_v26 = vpop.permute.xlu0 %638  ;;  %v644_v27 = vpop.permute.xlu1 %643 }
 0x18f   :  { %870 = vmatpush3.bf16.msra.mxu1 %v477_v16 }
 0x190   :  { %871 = vmatprep.subr.bf16.mxu1 %v476_v21  ;;  %v654_v30 = vpop.permute.xlu1 %653 }
 0x193   :  { %872 = vmatpush3.bf16.msra.mxu1 %v476_v21 }
 0x194   :  { %873 = vmatprep.subr.bf16.mxu1 %v475_v28  ;;  %v737_v40 = vpop.permute.xlu1 %736 }
 0x197   :  { %874 = vmatpush3.bf16.msra.mxu1 %v475_v28  ;;  %v649_v28 = vpop.permute.xlu0 %648 }
 0x198   :  { %875 = vmatprep.subr.bf16.mxu1 %v474_v34 }
 0x19b   :  { %876 = vmatpush3.bf16.msra.mxu1 %v474_v34  ;;  %v732_v35 = vpop.permute.xlu0 %731 }
 0x19c   :  { %877 = vmatprep.subr.bf16.mxu1 %v473_v45 }
 0x19f   :  { %878 = vmatpush3.bf16.msra.mxu1 %v473_v45  ;;  %v742_v43 = vpop.permute.xlu0 %741 }
 0x1a0   :  { %879 = vmatprep.subr.bf16.mxu1 %v472_v49 }
 0x1a3   :  { %880 = vmatpush3.bf16.msra.mxu1 %v472_v49 }
 0x1a4   :  { %881 = vmatprep.subr.bf16.mxu1 %v471_v51 }
 0x1a7   :  { %882 = vmatpush3.bf16.msra.mxu1 %v471_v51 }
 0x1aa   :  { %884 = vmatmul.mubr.bf16.vlgmr.msra.gmra.mxu1 %v916_v41  ;;  %v747_v41 = vpop.permute.xlu1 %746 }
 0x1ab   :  { %887 = vmatprep.mubr.bf16.mxu1 %v917_v44 }
 0x1b2   :  { %888 = vmatmul.mubr.bf16.gmra.mxu1 %v918_v42 }
 0x26a   :  { %v885_v54 = vpop.f32.mrf.mxu1 }
 0x26b   :  { %v594_v10 = vadd.f32 %v885_v54, %v500_v4 }
 0x26c   :  { %v585_v56 = vpop.f32.mrf.mxu1 }
 0x26d   :  { %v618_v19 = vmax.f32 %v594_v10, 0.0  ;;  %v586_v20 = vadd.f32 %v585_v56, %v490_v18 }
 0x26e   :  { %v886_v57 = vpop.f32.mrf.mxu1 }
 0x26f   :  { %v597_v6 = vadd.f32 %v886_v57, %v505_v0  ;;  %v616_v23 = vmax.f32 %v586_v20, 0.0 }
 0x270   :  { %v588_v59 = vpop.f32.mrf.mxu1 }
 0x271   :  { %v619_v15 = vmax.f32 %v597_v6, 0.0  ;;  %v589_v16 = vadd.f32 %v588_v59, %v495_v14 }
 0x272   :  { %v889_v61 = vpop.f32.mrf.mxu1 }
 0x273   :  { %v610_v63 = vadd.f32 %v889_v61, %v520_v55  ;;  %v629_v21 = vpack.c.bf16 %v619_v15, %v618_v19  ;;  %v617_v22 = vmax.f32 %v589_v16, 0.0  ;;  %v769_v55 = vshrl.u32 %v768_v52, 7 }
 0x274   :  { %v601_v62 = vpop.f32.mrf.mxu1 }
 0x275   :  { %v602_v2 = vadd.f32 %v601_v62, %v510_v60  ;;  %v622_v7 = vmax.f32 %v610_v63, 0.0  ;;  %v628_v24 = vpack.c.bf16 %v617_v22, %v616_v23  ;;  %v766_v60 = vpop.permute.xlu0 %765 }
 0x276   :  { %v890_v1 = vpop.f32.mrf.mxu1 }
 0x277   :  { %v613_v3 = vadd.f32 %v890_v1, %v525_v53  ;;  %v620_v11 = vmax.f32 %v602_v2, 0.0 }
 0x278   :  { %v604_v5 = vpop.f32.mrf.mxu1 }
 0x279   :  { %v623_v8 = vmax.f32 %v613_v3, 0.0  ;;  %v605_v9 = vadd.f32 %v604_v5, %v515_v58  ;;  %v770_v58 = vsub.s32 0, %v769_v55 }
 0x27b   :  { %v631_v12 = vpack.c.bf16 %v623_v8, %v622_v7  ;;  %v621_v13 = vmax.f32 %v605_v9, 0.0  ;;  %v771_v62 = vrot.slane %v766_v60, %v770_v58 }
 0x27d   :  { %v630_v17 = vpack.c.bf16 %v621_v13, %v620_v11  ;;  %891 = vmatprep.subr.bf16.mxu0 %v631_v12 }
 0x27e   :  { %892 = vmatpush3.bf16.msra.mxu0 %v631_v12 }
 0x27f   :  { %893 = vmatprep.subr.bf16.mxu0 %v630_v17 }
 0x282   :  { %894 = vmatpush3.bf16.msra.mxu0 %v630_v17 }
 0x283   :  { %895 = vmatprep.subr.bf16.mxu0 %v629_v21 }
 0x286   :  { %896 = vmatpush3.bf16.msra.mxu0 %v629_v21 }
 0x287   :  { %897 = vmatprep.subr.bf16.mxu0 %v628_v24 }
 0x28a   :  { %898 = vmatpush3.bf16.msra.mxu0 %v628_v24 }
 0x28d   :  { %900 = vmatmul.mubr.msk.bf16.vlgmr.msra.gmra.mxu0 %vm325_vm0, %v920_v25 }
 0x34d   :  { %v901_v29 = vpop.f32.mrf.mxu0 }
 0x34e   :  { %v715_v34 = vadd.f32 %v901_v29, %v649_v28 }
 0x34f   :  { %v706_v31 = vpop.f32.mrf.mxu0 }
 0x350   :  { %v707_v32 = vadd.f32 %v706_v31, %v639_v26  ;;  %v723_v45 = vmax.f32 %v715_v34, 0.0 }
 0x351   :  { %v902_v33 = vpop.f32.mrf.mxu0 }
 0x352   :  { %v721_v37 = vmax.f32 %v707_v32, 0.0  ;;  %v718_v38 = vadd.f32 %v902_v33, %v654_v30  ;;  %v751_v50 = vmul.f32 %v742_v43, %v723_v45 }
 0x353   :  { %v709_v36 = vpop.f32.mrf.mxu0 }
 0x354   :  { %v710_v39 = vadd.f32 %v709_v36, %v644_v27  ;;  %v749_v47 = vmul.f32 %v732_v35, %v721_v37  ;;  %v724_v48 = vmax.f32 %v718_v38, 0.0 }
 0x356   :  { %v722_v46 = vmax.f32 %v710_v39, 0.0  ;;  %v752_v44 = vmul.f32 %v747_v41, %v724_v48 }
 0x358   :  { %v750_v49 = vmul.f32 %v737_v40, %v722_v46 }
 0x35a   :  { %v753_v51 = vadd.f32 %v750_v49, %v749_v47 }
 0x35c   :  { %v754_v42 = vadd.f32 %v753_v51, %v751_v50 }
 0x35e   :  { %v755_v53 = vadd.f32 %v754_v42, %v752_v44 }
 0x360   :  { %v756_v54 = vrot.slane %v755_v53, 4 }
 0x362   :  { %v757_v56 = vadd.f32 %v756_v54, %v755_v53 }
 0x364   :  { %v758_v57 = vrot.slane %v757_v56, 2 }
 0x366   :  { %v759_v59 = vadd.f32 %v758_v57, %v757_v56 }
 0x368   :  { %v760_v61 = vrot.slane %v759_v59, 1 }
 0x36a   :  { %v761_v63 = vadd.f32 %v760_v61, %v759_v59 }
 0x36c   :  { %v772_v0 = vadd.f32 %v771_v62, %v761_v63 }
 0x36e   :  { %773 = vst [vmem:[#allocation3] sm:$0x1] %v772_v0 }
 0x36f   :  { %932 = shalt.err (!%p929_p4)
}
 0x370   :  { %783 = dma.vmem_to_hbm [thread:$0]  %s781_s27, 16, %s1230_s11, [#allocation4]  }
 0x371   :  { %941 = dma.done.wait [#allocation4], 16  }
 0x372   :  { %942 = vsyncadd [#allocation4], 4294967280 }
 0x373   :  { %787 = vsyncpa [#allocation4], 1 }

</bundles_post_ra>
